<compile_context>
chip_gen: v6e
topology: v6e:2x2x1
jax: 0.10.0
libtpu: 0.0.40
codegen_flags: <defaults>
</compile_context>

<pallas_src>
import functools

import jax
import jax.numpy as jnp
from jax import lax
from jax.experimental import pallas as pl
from jax.experimental.pallas import tpu as pltpu

_NEG = -1.0e9   # stand-in for -inf padding of max_pool2d (pooled values are >= 0)
_EPS = 1e-7


# ---------------------------------------------------------------------------
# Shifted reads via pltpu.roll + iota masks (no concatenate / unaligned slices)
# ---------------------------------------------------------------------------
def _make_shifter(shape):
    """Returns (shift, row_idx, col_idx) for 2-D arrays of `shape`.

    shift(x, d, axis): out[i] = x[i - d] along `axis` (static d); out-of-range
    positions become _NEG.  Masks are built once per (axis, d) and reused
    across all pooling calls in the kernel.
    """
    row = lax.broadcasted_iota(jnp.int32, shape, 0)
    col = lax.broadcasted_iota(jnp.int32, shape, 1)
    idxs = (row, col)
    cache = {}

    def shift(x, d, axis):
        size = shape[axis]
        if d == 0:
            return x
        if d >= size or d <= -size:                  # window fully out of range
            return jnp.full(shape, _NEG, x.dtype)
        key = (axis, d)
        mask = cache.get(key)
        if mask is None:
            idx = idxs[axis]
            mask = (idx >= d) if d > 0 else (idx < size + d)
            cache[key] = mask
        r = pltpu.roll(x, shift=d % size, axis=axis)
        return jnp.where(mask, r, _NEG)

    return shift, row, col


def _maxpool_same(x, k, shift):
    """Stride-1 'same' max pool with odd kernel k and -inf padding.

    Separable (W then H).  Per axis the centred window [i-p, i+p] is the max of
    a forward half-window [i, i+p] and a backward half-window [i-p, i]; each
    half is built by log-doubling running maxima (log2(p+1)+1 max ops), which
    clips correctly at both image borders.
    """
    if k <= 1:
        return x
    p = (k - 1) // 2
    m = p + 1                                        # half window incl. centre
    L = 1 << (m.bit_length() - 1)                    # largest power of two <= m

    def directional(y, axis, sgn):
        # sgn=-1: max over [i, i+m-1]; sgn=+1: max over [i-m+1, i] (edge-clipped)
        b = y
        w = 1
        while w < L:
            b = jnp.maximum(b, shift(b, sgn * w, axis))
            w *= 2
        if m == L:
            return b
        return jnp.maximum(b, shift(b, sgn * (m - L), axis))

    def pool_axis(y, axis):
        return jnp.maximum(directional(y, axis, -1), directional(y, axis, +1))

    return pool_axis(pool_axis(x, 1), 0)             # lanes (W) then sublanes (H)


# ---------------------------------------------------------------------------
# Kernel A: per-pixel channel max and inverse softmax denominator
# ---------------------------------------------------------------------------
def _softmax_stats_kernel(pred_ref, mx_ref, invd_ref):
    x = pred_ref[...].astype(jnp.float32)            # (C, th, Wp)
    m = jnp.max(x, axis=0)                           # (th, Wp)
    s = jnp.sum(jnp.exp(x - m[None, :, :]), axis=0)  # (th, Wp)
    mx_ref[...] = m
    invd_ref[...] = 1.0 / s


# ---------------------------------------------------------------------------
# Kernel B: per-(batch, class) boundary maps + BF1
# ---------------------------------------------------------------------------
def _boundary_channel_kernel(logit_ref, mx_ref, invd_ref, gt_ref, out_ref, *,
                             theta0, theta, valid_h, valid_w):
    Hp, Wp = gt_ref.shape
    c = pl.program_id(1)

    shift, row, col = _make_shifter((Hp, Wp))
    masked = (valid_h != Hp) or (valid_w != Wp)
    valid = (row < valid_h) & (col < valid_w) if masked else None

    def pool(x, k):
        if masked:
            x = jnp.where(valid, x, _NEG)            # padded pixels act as -inf
        return _maxpool_same(x, k, shift)

    # softmax probability of class c (same max-subtraction as the reference)
    p = jnp.exp(logit_ref[...].astype(jnp.float32) - mx_ref[...]) * invd_ref[...]
    oh = (gt_ref[...] == c).astype(jnp.float32)      # one-hot plane of class c

    inv_oh = 1.0 - oh
    inv_p = 1.0 - p

    gt_b = pool(inv_oh, theta0) - inv_oh
    pred_b = pool(inv_p, theta0) - inv_p
    gt_b_ext = pool(gt_b, theta)
    pred_b_ext = pool(pred_b, theta)

    if masked:                                       # exclude padded pixels
        vf = valid.astype(jnp.float32)
        gt_b = gt_b * vf
        pred_b = pred_b * vf

    s_pb_gbe = jnp.sum(pred_b * gt_b_ext, keepdims=True)   # (1, 1)
    s_pb = jnp.sum(pred_b, keepdims=True)
    s_pbe_gb = jnp.sum(pred_b_ext * gt_b, keepdims=True)
    s_gb = jnp.sum(gt_b, keepdims=True)

    P = s_pb_gbe / (s_pb + _EPS)
    R = s_pbe_gb / (s_gb + _EPS)
    BF1 = 2.0 * P * R / (P + R + _EPS)

    out_ref[...] = jnp.broadcast_to(1.0 - BF1, out_ref.shape).astype(out_ref.dtype)


# ---------------------------------------------------------------------------
# Wrapper
# ---------------------------------------------------------------------------
def _compiler_params(working_set_bytes, dims):
    limit = int(max(32 * 1024 * 1024,
                    min(64 * 1024 * 1024, int(1.5 * working_set_bytes))))
    return pltpu.CompilerParams(dimension_semantics=dims,
                                vmem_limit_bytes=limit)


def boundary_loss(pred, gt, theta0=19, theta=19):
    """pred: (N, C, H, W) logits (any float dtype); gt: (N, H, W) int labels."""
    assert theta0 % 2 == 1 and theta % 2 == 1, "odd pooling windows only"
    N, C, H, W = pred.shape
    gt = gt.astype(jnp.int32)

    # Pad H, W up to native (8, 128) vreg tiling so in-kernel rolls are
    # tile-aligned; padded pixels are masked out inside the kernel.
    Hp = (H + 7) // 8 * 8
    Wp = (W + 127) // 128 * 128
    if (Hp, Wp) != (H, W):
        pred = jnp.pad(pred, ((0, 0), (0, 0), (0, Hp - H), (0, Wp - W)))
        gt = jnp.pad(gt, ((0, 0), (0, Hp - H), (0, Wp - W)), constant_values=C)

    in_bytes = jnp.dtype(pred.dtype).itemsize

    # ---- kernel A: softmax statistics (channel max, 1 / sum(exp)) ----
    th = Hp
    if Hp > 256:
        for cand in (256, 128, 64, 32, 16, 8):
            if Hp % cand == 0:
                th = cand
                break
    need_a = 2 * C * th * Wp * in_bytes + 3 * C * th * Wp * 4 + 4 * th * Wp * 4
    mx, invd = pl.pallas_call(
        _softmax_stats_kernel,
        out_shape=(jax.ShapeDtypeStruct((N, Hp, Wp), jnp.float32),
                   jax.ShapeDtypeStruct((N, Hp, Wp), jnp.float32)),
        grid=(N, Hp // th),
        in_specs=[pl.BlockSpec((None, C, th, Wp), lambda n, h: (n, 0, h, 0))],
        out_specs=(pl.BlockSpec((None, th, Wp), lambda n, h: (n, h, 0)),
                   pl.BlockSpec((None, th, Wp), lambda n, h: (n, h, 0))),
        compiler_params=_compiler_params(need_a, ("parallel", "parallel")),
    )(pred)

    # ---- kernel B: per-(batch, class) boundary maps + BF1 ----
    kernel = functools.partial(
        _boundary_channel_kernel,
        theta0=theta0, theta=theta, valid_h=H, valid_w=W)
    need_b = 2 * Hp * Wp * (in_bytes + 3 * 4) + 20 * Hp * Wp * 4 + 2 * 8 * 128 * 4
    out = pl.pallas_call(
        kernel,
        out_shape=jax.ShapeDtypeStruct((N, C, 8, 128), jnp.float32),
        grid=(N, C),
        in_specs=[
            pl.BlockSpec((None, None, Hp, Wp), lambda n, c: (n, c, 0, 0)),  # logits[n, c]
            pl.BlockSpec((None, Hp, Wp), lambda n, c: (n, 0, 0)),           # channel max
            pl.BlockSpec((None, Hp, Wp), lambda n, c: (n, 0, 0)),           # 1 / sum(exp)
            pl.BlockSpec((None, Hp, Wp), lambda n, c: (n, 0, 0)),           # labels
        ],
        out_specs=pl.BlockSpec((None, None, 8, 128), lambda n, c: (n, c, 0, 0)),
        compiler_params=_compiler_params(need_b, ("parallel", "parallel")),
    )(pred, mx, invd, gt)

    one_minus_bf1 = out[:, :, 0, 0]                  # (N, C)
    return jnp.mean(one_minus_bf1)


# ---------------------------------------------------------------------------
# Pure-JAX reference mirroring the PyTorch forward (sanity check only)
# ---------------------------------------------------------------------------
def _reference_boundary_loss(pred, gt, theta0=19, theta=19):
    n, c, h, w = pred.shape
    eps = 1e-7
    p0 = (theta0 - 1) // 2
    p1 = (theta - 1) // 2

    def mp(x, k, p):
        return lax.reduce_window(
            x, -jnp.inf, lax.max,
            window_dimensions=(1, 1, k, k), window_strides=(1, 1, 1, 1),
            padding=[(0, 0), (0, 0), (p, p), (p, p)])

    sm = jax.nn.softmax(pred, axis=1)
    oh = jnp.transpose(jax.nn.one_hot(gt, c, dtype=jnp.float32), (0, 3, 1, 2))
    gt_b = mp(1.0 - oh, theta0, p0) - (1.0 - oh)
    pred_b = mp(1.0 - sm, theta0, p0) - (1.0 - sm)
    gt_b_ext = mp(gt_b, theta, p1)
    pred_b_ext = mp(pred_b, theta, p1)

    gt_b = gt_b.reshape(n, c, -1)
    pred_b = pred_b.reshape(n, c, -1)
    gt_b_ext = gt_b_ext.reshape(n, c, -1)
    pred_b_ext = pred_b_ext.reshape(n, c, -1)

    P = jnp.sum(pred_b * gt_b_ext, axis=2) / (jnp.sum(pred_b, axis=2) + eps)
    R = jnp.sum(pred_b_ext * gt_b, axis=2) / (jnp.sum(gt_b, axis=2) + eps)
    BF1 = 2 * P * R / (P + R + eps)
    return jnp.mean(1.0 - BF1)


if __name__ == "__main__":
    key = jax.random.PRNGKey(0)
    k1, k2 = jax.random.split(key)

    N, C, H, W = 2, 4, 16, 16
    pred = jax.random.normal(k1, (N, C, H, W), dtype=jnp.float32)
    gt = jax.random.randint(k2, (N, H, W), 0, C, dtype=jnp.int32)

    loss = jax.block_until_ready(boundary_loss(pred, gt))   # theta0 = theta = 19
    ref = jax.block_until_ready(_reference_boundary_loss(pred, gt))

    assert jnp.isfinite(loss), "non-finite loss"
    assert abs(float(loss) - float(ref)) < 5e-4, (float(loss), float(ref))
    print("KERNEL_OK")
</pallas_src>

<mosaic_0001>
module attributes {stable_mosaic.version = 11 : i64} {
  func.func @_softmax_stats_kernel(%arg0: i32, %arg1: i32, %arg2: memref<1x4x16x128xf32, #tpu.memory_space<vmem>>, %arg3: memref<1x16x128xf32, #tpu.memory_space<vmem>>, %arg4: memref<1x16x128xf32, #tpu.memory_space<vmem>>) attributes {dimension_semantics = [#tpu.dimension_semantics<parallel>, #tpu.dimension_semantics<parallel>], iteration_bounds = array<i64: 2, 1>, scalar_prefetch = 0 : i64, scratch_operands = 0 : i64, tpu.core_type = #tpu.core_type<tc>, window_params = [{transform_indices = @transform_0, window_bounds = array<i64: 1, 4, 16, 128>}, {transform_indices = @transform_1, window_bounds = array<i64: 1, 16, 128>}, {transform_indices = @transform_2, window_bounds = array<i64: 1, 16, 128>}]} {
    %c0 = arith.constant 0 : index
    %c0_0 = arith.constant 0 : index
    %c0_1 = arith.constant 0 : index
    %c0_2 = arith.constant 0 : index
    %0 = vector.load %arg2[%c0, %c0_0, %c0_1, %c0_2] : memref<1x4x16x128xf32, #tpu.memory_space<vmem>>, vector<1x4x16x128xf32>
    %1 = vector.shape_cast %0 : vector<1x4x16x128xf32> to vector<4x16x128xf32>
    %cst = arith.constant dense<0xFF800000> : vector<16x128xf32>
    %2 = vector.multi_reduction <maximumf>, %1, %cst [0] : vector<4x16x128xf32> to vector<16x128xf32>
    %3 = vector.shape_cast %2 : vector<16x128xf32> to vector<1x16x128xf32>
    %4 = vector.broadcast %3 : vector<1x16x128xf32> to vector<4x16x128xf32>
    %5 = arith.subf %1, %4 : vector<4x16x128xf32>
    %6 = math.exp %5 : vector<4x16x128xf32>
    %cst_3 = arith.constant dense<0.000000e+00> : vector<16x128xf32>
    %7 = vector.multi_reduction <add>, %6, %cst_3 [0] : vector<4x16x128xf32> to vector<16x128xf32>
    %c0_4 = arith.constant 0 : index
    %c0_5 = arith.constant 0 : index
    %c0_6 = arith.constant 0 : index
    %8 = vector.load %arg3[%c0_4, %c0_5, %c0_6] : memref<1x16x128xf32, #tpu.memory_space<vmem>>, vector<1x16x128xf32>
    %9 = vector.shape_cast %8 : vector<1x16x128xf32> to vector<16x128xf32>
    %10 = vector.shape_cast %2 : vector<16x128xf32> to vector<1x16x128xf32>
    tpu.vector_store %arg3[%c0_4, %c0_5, %c0_6], %10 {strides = array<i32>} : memref<1x16x128xf32, #tpu.memory_space<vmem>>, vector<1x16x128xf32>,
    %cst_7 = arith.constant 1.000000e+00 : f32
    %11 = vector.broadcast %cst_7 : f32 to vector<16x128xf32>
    %12 = arith.divf %11, %7 : vector<16x128xf32>
    %c0_8 = arith.constant 0 : index
    %c0_9 = arith.constant 0 : index
    %c0_10 = arith.constant 0 : index
    %13 = vector.load %arg4[%c0_8, %c0_9, %c0_10] : memref<1x16x128xf32, #tpu.memory_space<vmem>>, vector<1x16x128xf32>
    %14 = vector.shape_cast %13 : vector<1x16x128xf32> to vector<16x128xf32>
    %15 = vector.shape_cast %12 : vector<16x128xf32> to vector<1x16x128xf32>
    tpu.vector_store %arg4[%c0_8, %c0_9, %c0_10], %15 {strides = array<i32>} : memref<1x16x128xf32, #tpu.memory_space<vmem>>, vector<1x16x128xf32>,
    return
  }
  func.func @transform_0(%arg0: i32, %arg1: i32) -> (i32, i32, i32, i32) {
    %c0_i32 = arith.constant 0 : i32
    %c0_i32_0 = arith.constant 0 : i32
    %c0_i32_1 = arith.constant 0 : i32
    return %arg0, %c0_i32, %arg1, %c0_i32_0 : i32, i32, i32, i32
  }
  func.func @transform_1(%arg0: i32, %arg1: i32) -> (i32, i32, i32) {
    %c0_i32 = arith.constant 0 : i32
    %c0_i32_0 = arith.constant 0 : i32
    return %arg0, %arg1, %c0_i32 : i32, i32, i32
  }
  func.func @transform_2(%arg0: i32, %arg1: i32) -> (i32, i32, i32) {
    %c0_i32 = arith.constant 0 : i32
    %c0_i32_0 = arith.constant 0 : i32
    return %arg0, %arg1, %c0_i32 : i32, i32, i32
  }
}

</mosaic_0001>

<bundles_post_ra>
// kernel: tpu_custom_call.1
= control target key start
LH: loop header
LB: loop body
LE: loop exit
PB: predicated region body
PF: predicated region fallthrough
CT: control target
= control target key end

     0   :  { %8 = vsyncpa [#allocation3], 0  ;;  %s873_s0 = inlined_call_operand.hbm [shape: f32[2,4,16,128], index: 0, kind: input, shape index: {}]   ;;  %s874_s1 = inlined_call_operand.hbm [shape: f32[2,16,128], index: 1, kind: output, shape index: {0}]   ;;  %s875_s2 = inlined_call_operand.hbm [shape: f32[2,16,128], index: 2, kind: output, shape index: {1}]  }
   0x1   :  { %10 = vsyncpa [#allocation3 + $0x1], 0 }
   0x2   :  { %11 = vsyncpa [#allocation4], 0 }
   0x3   :  { %13 = vsyncpa [#allocation4 + $0x1], 0 }
   0x4   :  { %14 = vsyncpa [#allocation7], 0 }
   0x5   :  { %16 = vsyncpa [#allocation7 + $0x1], 0  ;;  %s684_s9 = smov 0   ;;  %s686_s10 = smov 0  }
   0x6   :  { %s688_s11 = smov 0   ;;  %s690_s12 = smov 0  }
   0x7   :  { %s692_s13 = smov 0   ;;  %s694_s14 = smov 0  }
   0x8 LB: > { %s409_s15 = sadd.s32 4294967295, %s660_s14   ;;  %s410_s16 = sadd.s32 4294967294, %s660_s14   ;;  %s660_s14 = sphi %s694_s14, %s22_s14   ;;  %s656_s13 = sphi %s692_s13, %s886_s13   ;;  %s652_s12 = sphi %s690_s12, %s885_s12   ;;  %s648_s11 = sphi %s688_s11, %s884_s11   ;;  %s644_s10 = sphi %s686_s10, %s883_s10   ;;  %s640_s9 = sphi %s684_s9, %s882_s9  }
   0x9   : > { %s34_s17 = sadd.s32 1, %s656_s13  ;;  %s43_s18 = sadd.s32 1, %s648_s11 }
   0xa   : > { %p36_p0 = scmp.ge.s32.totalorder %s34_s17, 2  ;;  %p50_p1 = scmp.ne.s32.totalorder %s648_s11, %s644_s10 }
   0xb   : > { %p51_p2 = scmp.eq.s32.totalorder %s660_s14, 0  ;;  %p56_p3 = scmp.ne.s32.totalorder %s644_s10, %s640_s9 }
   0xc   : > { %s888_s17 = smov (%p36_p0, %s34_s17), 0  ;;  %p57_p5 = scmp.eq.s32.totalorder %s409_s15, 0 }
   0xd   : > { %p725_p4 = por %p51_p2, %p50_p1  ;;  %s38_s20 = ssub.s32 %s656_s13, %s888_s17 }
   0xe   : > { %p82_p6 = scmp.eq.s32.totalorder %s409_s15, 1  ;;  %p41_p7 = scmp.eq.s32.totalorder %s38_s20, 0 }
   0xf   : > { %p731_p8 = por %p57_p5, %p56_p3  ;;  %p88_p10 = scmp.eq.s32.totalorder %s410_s16, 1 }
  0x10   : > { %p735_p9 = por %p82_p6, %p50_p1  ;;  %p448_p13 = scmp.lt.s32.totalorder %s660_s14, 2 }
  0x11   : > { %s740_s23 = scalar_select %p41_p7, %s648_s11, %s43_s18  }
  0x12   : > { %p742_p11 = por %p88_p10, %p56_p3  ;;  %s136_s25 = sand.u32 1, %s648_s11  }
  0x13   : > { %s413_s26 = sshll.u32 %s136_s25, 6  ;;  %s428_s27 = sshll.u32 %s656_s13, 10 }
  0x14   : > { %s148_s30 = scalar_lea.hbm %s873_s0, %s428_s27  ;;  %s140_s3 = scalar_lea.vmem [#allocation2], %s413_s26 }
  0x15   : > { %s149_s4 = sshll.u32 %s140_s3, 4  ;;  %p755_p0 = pnand %p448_p13, %p725_p4  ;;  %s150_s4 = int_to_ptr.vmem [resolvable:$true] %s149_s4 }
  0x16   : > { %p416_p1 = scmp.ge.s32.totalorder %s660_s14, 1  ;;  %s137_s6 = scalar_lea.sflag [#allocation3], %s136_s25 }
  0x17   : > { %p524_p2 = pneg %p755_p0  ;;  %s535_s7 = scalar_lea.vmem %s150_s4, 1024 }
  0x18   : > { %p536_p3 = scmp.ne.s32.totalorder %s150_s4, %s535_s7  ;;  %s662_s8 = smov [#allocation2]  }
  0x19   : > { %s540_s15 = sshll.u32 %s662_s8, 4  ;;  %s541_s15 = int_to_ptr.vmem [resolvable:$false] %s540_s15 }
  0x1a   : > { %p538_p5 = pnand %p536_p3, %p524_p2  ;;  %s542_s16 = scalar_lea.vmem %s541_s15, 2048 }
  0x1b   : > { %p543_p7 = scmp.lt.s32.totalorder %s150_s4, %s541_s15  ;;  %p544_p10 = scmp.lt.s32.totalorder %s542_s16, %s535_s7 }
  0x1c   : > { %p539_p6 = pneg %p538_p5 }
  0x1d   : > { %p545_p12 = por %p544_p10, %p543_p7 }
  0x1f   : > { %p546_p4 = pnand %p545_p12, %p539_p6 }
  0x21   : > { %549 = shalt.err (!%p546_p4)
}
  0x22   : > { %s663_s18 = smov 128   ;;  %s664_s19 = smov 8  }
  0x23   : > { %440 = dma.hbm_to_vmem [thread:$0]  (!%p755_p0), %s148_s30, 1024, %s150_s4, %s137_s6, %s663_s18, %s663_s18, %s664_s19  }
  0x24   : > { %p157_p13 = scmp.lt.s32.totalorder %s660_s14, 3 }
  0x26   : > { %p158_p2 = pnand %p416_p1, %p157_p13 }
  0x27   : > { %s768_s20 = sand.u32 (!%p158_p2), 1, %s644_s10  }
  0x28   : > { %161 = sbr.rel (%p158_p2) target bundleno = 120 (0x78), region = 24  ;;  %s417_s25 = sshll.u32 (!%p158_p2), %s768_s20, 6 }
  0x29   : > { %s164_s26 = scalar_lea.sflag (!%p158_p2), [#allocation3], %s768_s20  ;;  %s167_s27 = scalar_lea.vmem (!%p158_p2), [#allocation2], %s417_s25 }
  0x2d   : > { %627 = dma.done.wait (%p731_p8), %s164_s26, 1024  }
  0x2e   : > { %629 = vsyncadd (%p731_p8), %s164_s26, 4294966272  ;;  %s418_s28 = sshll.u32 %s768_s20, 4  ;;  %v196_v0 = vld [vmem:[%s167_s27] sm:$0xff]  ;;  %v198_v1 = vld [vmem:[%s167_s27 + $0x10] sm:$0xff]  ;;  %s429_s21 = sshll.u32 %s652_s12, 8 }
  0x2f   : > { %v200_v2 = vld [vmem:[%s167_s27 + $0x20] sm:$0xff]  ;;  %v202_v3 = vld [vmem:[%s167_s27 + $0x30] sm:$0xff]  ;;  %v197_v5 = vld [vmem:[%s167_s27 + $0x8] sm:$0xff]  ;;  %s185_s29 = scalar_lea.vmem [#allocation5], %s418_s28  ;;  %s787_s5 = scalar_lea.hbm %s874_s1, %s429_s21 }
  0x30   : > { %v204_v4 = vmax.f32 %v196_v0, %v200_v2  ;;  %v199_v6 = vld [vmem:[%s167_s27 + $0x18] sm:$0xff]  ;;  %v205_v7 = vmax.f32 %v198_v1, %v202_v3  ;;  %v201_v8 = vld [vmem:[%s167_s27 + $0x28] sm:$0xff]  ;;  %s269_s30 = sshll.u32 %s185_s29, 4  ;;  %s249_s6 = scalar_lea.sflag [#allocation4], %s768_s20  ;;  %s780_s30 = int_to_ptr.vmem [resolvable:$true] %s269_s30 }
  0x31   : > { %v203_v9 = vld [vmem:[%s167_s27 + $0x38] sm:$0xff]  ;;  %v207_v10 = vmax.f32 %v197_v5, %v201_v8  ;;  %s550_s7 = scalar_lea.vmem %s780_s30, 256  ;;  %s665_s8 = smov [#allocation5]  }
  0x32   : > { %v208_v11 = vmax.f32 %v199_v6, %v203_v9  ;;  %v206_v12 = vmax.f32 %v204_v4, %v205_v7  ;;  %p551_p8 = scmp.ne.s32.totalorder %s780_s30, %s550_s7  ;;  %s554_s15 = sshll.u32 %s665_s8, 4  ;;  %s555_s15 = int_to_ptr.vmem [resolvable:$false] %s554_s15 }
  0x33   : > { %s556_s16 = scalar_lea.vmem %s555_s15, 512  ;;  %p557_p1 = scmp.lt.s32.totalorder %s780_s30, %s555_s15 }
  0x34   : > { %v209_v13 = vmax.f32 %v207_v10, %v208_v11  ;;  %v210_v14 = vsub.f32 %v196_v0, %v206_v12  ;;  %v212_v15 = vsub.f32 %v198_v1, %v206_v12  ;;  %v214_v16 = vsub.f32 %v200_v2, %v206_v12  ;;  %240 = vst [vmem:[%s185_s29] sm:$0xff] %v206_v12  ;;  %p552_p12 = pnand %p551_p8, %p735_p9  ;;  %p558_p3 = scmp.lt.s32.totalorder %s556_s16, %s550_s7 }
  0x35   : > { %v216_v17 = vsub.f32 %v202_v3, %v206_v12 }
  0x36   : > { %v211_v18 = vsub.f32 %v197_v5, %v209_v13  ;;  %v213_v19 = vsub.f32 %v199_v6, %v209_v13  ;;  %241 = vst [vmem:[%s185_s29 + $0x8] sm:$0xff] %v209_v13  ;;  %v218_v20 = vmul.f32 1.442695, %v210_v14  ;;  %v222_v21 = vmul.f32 1.442695, %v212_v15  ;;  %p553_p0 = pneg %p552_p12  ;;  %p559_p5 = por %p558_p3, %p557_p1 }
  0x37   : > { %v226_v22 = vmul.f32 1.442695, %v214_v16  ;;  %v215_v23 = vsub.f32 %v201_v8, %v209_v13  ;;  %v230_v24 = vmul.f32 1.442695, %v216_v17  ;;  %v217_v25 = vsub.f32 %v203_v9, %v209_v13 }
  0x38   : > { %502 = vpow2.f32 %v218_v20  ;;  %v220_v26 = vmul.f32 1.442695, %v211_v18  ;;  %p560_p6 = pnand %p559_p5, %p553_p0 }
  0x3a   : > { %563 = shalt.err (!%p560_p6)
}
  0x3b   : > { %s564_s18 = scalar_lea.hbm %s787_s5, 256  ;;  %s568_s26 = scalar_lea.hbm %s874_s1, 512 }
  0x3c   : > { %p565_p7 = scmp.ne.s32.totalorder %s787_s5, %s564_s18  ;;  %p569_p13 = scmp.lt.s32.totalorder %s787_s5, %s874_s1 }
  0x3d   : > { %p570_p2 = scmp.lt.s32.totalorder %s568_s26, %s564_s18 }
  0x3e   : > { %p566_p10 = pnand %p565_p7, %p735_p9 }
  0x3f   : > { %p571_p8 = por %p570_p2, %p569_p13 }
  0x40   : > { %p567_p4 = pneg %p566_p10 }
  0x42   : > { %p572_p12 = pnand %p571_p8, %p567_p4 }
  0x44   : > { %575 = shalt.err (!%p572_p12)
}
  0x45   : > { %s666_s3 = smov 128   ;;  %s667_s4 = smov 8   ;;  %504 = vpow2.f32 %v222_v21  ;;  %v224_v27 = vmul.f32 1.442695, %v213_v19  ;;  %v228_v28 = vmul.f32 1.442695, %v215_v23  ;;  %v503_v30 = vpop.eup %502 }
  0x46   : > { %433 = dma.vmem_to_hbm [thread:$0]  (%p735_p9), %s780_s30, 256, %s787_s5, %s249_s6, %s666_s3, %s666_s3, %s667_s4   ;;  %506 = vpow2.f32 %v226_v22  ;;  %v232_v29 = vmul.f32 1.442695, %v217_v25 }
  0x47   : > { %508 = vpow2.f32 %v230_v24  ;;  %s192_s30 = scalar_lea.vmem [#allocation6], %s418_s28  ;;  %s824_s8 = scalar_lea.hbm %s875_s2, %s429_s21 }
  0x48   : > { %510 = vpow2.f32 %v220_v26  ;;  %s287_s5 = sshll.u32 %s192_s30, 4  ;;  %s254_s15 = scalar_lea.sflag [#allocation7], %s768_s20  ;;  %s817_s5 = int_to_ptr.vmem [resolvable:$true] %s287_s5 }
  0x49   : > { %512 = vpow2.f32 %v224_v27  ;;  %s576_s16 = scalar_lea.vmem %s817_s5, 256  ;;  %s668_s28 = smov [#allocation6]  }
  0x4a   : > { %514 = vpow2.f32 %v228_v28  ;;  %p577_p0 = scmp.ne.s32.totalorder %s817_s5, %s576_s16  ;;  %s580_s18 = sshll.u32 %s668_s28, 4  ;;  %s581_s18 = int_to_ptr.vmem [resolvable:$false] %s580_s18 }
  0x4b   : > { %516 = vpow2.f32 %v232_v29  ;;  %s582_s12 = scalar_lea.vmem %s581_s18, 512  ;;  %p583_p5 = scmp.lt.s32.totalorder %s817_s5, %s581_s18 }
  0x4c   : > { %p578_p1 = pnand %p577_p0, %p735_p9  ;;  %p584_p6 = scmp.lt.s32.totalorder %s582_s12, %s576_s16 }
  0x4e   : > { %p579_p3 = pneg %p578_p1  ;;  %p585_p7 = por %p584_p6, %p583_p5 }
  0x50   : > { %p586_p10 = pnand %p585_p7, %p579_p3 }
  0x52   : > { %v505_v31 = vpop.eup %504 }
  0x53   : > { %v507_v32 = vpop.eup %506  ;;  %v234_v33 = vadd.f32 %v505_v31, %v503_v30 }
  0x54   : > { %v509_v34 = vpop.eup %508 }
  0x55   : > { %v511_v35 = vpop.eup %510  ;;  %v235_v36 = vadd.f32 %v507_v32, %v234_v33 }
  0x56   : > { %v513_v37 = vpop.eup %512 }
  0x57   : > { %v515_v38 = vpop.eup %514  ;;  %v236_v39 = vadd.f32 %v509_v34, %v235_v36  ;;  %v237_v40 = vadd.f32 %v513_v37, %v511_v35 }
  0x58   : > { %v517_v41 = vpop.eup %516 }
  0x59   : > { %v238_v42 = vadd.f32 %v515_v38, %v237_v40  ;;  %518 = vrcp.f32 %v236_v39 }
  0x5b   : > { %v239_v43 = vadd.f32 %v517_v41, %v238_v42 }
  0x5d   : > { %520 = vrcp.f32 %v239_v43 }
  0x66   : > { %v519_v44 = vpop.eup %518 }
  0x67   : > { %246 = vst [vmem:[%s192_s30] sm:$0xff] %v519_v44 }
  0x6a   : > { %v521_v45 = vpop.eup %520 }
  0x6b   : > { %247 = vst [vmem:[%s192_s30 + $0x8] sm:$0xff] %v521_v45 }
  0x6c   : > { %589 = shalt.err (!%p586_p10)
}
  0x6d   : > { %s590_s21 = scalar_lea.hbm %s824_s8, 256  ;;  %s594_s25 = scalar_lea.hbm %s875_s2, 512 }
  0x6e   : > { %p591_p4 = scmp.ne.s32.totalorder %s824_s8, %s590_s21  ;;  %p595_p8 = scmp.lt.s32.totalorder %s824_s8, %s875_s2 }
  0x6f   : > { %p596_p12 = scmp.lt.s32.totalorder %s594_s25, %s590_s21 }
  0x70   : > { %p592_p13 = pnand %p591_p4, %p735_p9 }
  0x71   : > { %p597_p0 = por %p596_p12, %p595_p8 }
  0x72   : > { %p593_p2 = pneg %p592_p13 }
  0x74   : > { %p598_p1 = pnand %p597_p0, %p593_p2 }
  0x76   : > { %601 = shalt.err (!%p598_p1)
}
  0x77   : > { %434 = dma.vmem_to_hbm [thread:$0]  (%p735_p9), %s817_s5, 256, %s824_s8, %s254_s15, %s666_s3, %s666_s3, %s667_s4  }
  0x78 PF: > { %s302_s29 = sand.u32 1, %s640_s9   ;;  %p881_p3 = scmp.ge.s32.totalorder %s660_s14, 2 }
  0x79   : > { %s303_s30 = scalar_lea.sflag [#allocation4], %s302_s29 }
  0x7a   : > { %p442_p5 = pnand %p881_p3, %p742_p11 }
  0x7c   : > { %p443_p6 = pneg %p442_p5 }
  0x7e   : > { %631 = dma.done.wait (%p443_p6), %s303_s30, 256  }
  0x7f   : > { %633 = vsyncadd (%p443_p6), %s303_s30, 4294967040  ;;  %s312_s6 = scalar_lea.sflag [#allocation7], %s302_s29 }
  0x80   : > { %635 = dma.done.wait (%p443_p6), %s312_s6, 256  }
  0x81   : > { %637 = vsyncadd (%p443_p6), %s312_s6, 4294967040  ;;  %s22_s14 = sadd.s32 1, %s660_s14   ;;  %s882_s9 = smov %s644_s10 }
  0x82   : > { %p19_p7 = scmp.ge.s32.totalorder %s22_s14, 4   ;;  %s883_s10 = smov %s648_s11 }
  0x83   : > { %s884_s11 = smov %s740_s23  ;;  %s885_s12 = smov %s656_s13 }
  0x84   : > { %s886_s13 = smov %s888_s17  ;;  %21 = sbr.rel (!%p19_p7) target bundleno = 8 (0x8), region = 86 }
  0x89   :  { %317 = vsyncpa [#allocation3], 1 }
  0x8a   :  { %319 = vsyncpa [#allocation3 + $0x1], 1 }
  0x8b   :  { %320 = vsyncpa [#allocation4], 1 }
  0x8c   :  { %322 = vsyncpa [#allocation4 + $0x1], 1 }
  0x8d   :  { %323 = vsyncpa [#allocation7], 1 }
  0x8e   :  { %325 = vsyncpa [#allocation7 + $0x1], 1 }

</bundles_post_ra>
